<compile_context>
chip_gen: v7x
topology: tpu7x:2x2x1
jax: 0.10.0
libtpu: 0.0.40
codegen_flags: <defaults>
</compile_context>

<pallas_src>
import functools

import jax
import jax.numpy as jnp
from jax import lax
from jax.experimental import pallas as pl
from jax.experimental.pallas import tpu as pltpu


def _reduce2(x, op):
    """Reduce an (S, K) tile to (1, 1): lanes (axis=1) first, then sublanes."""
    x = op(x, axis=1, keepdims=True)
    return op(x, axis=0, keepdims=True)


def _fps_kernel(pts_ref, out_ref, *, npoint, bt, hoist):
    # pts_ref: (bt*3, 8, K) f32 -- rows [3b, 3b+3) are the x/y/z planes of batch b;
    #                              point i of batch b sits at (i // K, i % K).
    # out_ref: (bt*8, P) i32    -- rows [8b, 8b+8) are batch b's slots; output slot
    #                              j sits at (j // P, j % P).
    S, K = pts_ref.shape[1], pts_ref.shape[2]
    P = out_ref.shape[1]
    n_total = S * K

    # Loop-invariant constants shared by all batches (vreg-resident).
    row = lax.broadcasted_iota(jnp.int32, (S, K), 0)
    col = lax.broadcasted_iota(jnp.int32, (S, K), 1)
    # Flat point index as f32 (exact for indices < 2^24) -- order-preserving, so the
    # min-reduction tie-break matches the CUDA kernel's first-max rule.
    flat_f = (row * K + col).astype(jnp.float32)
    big_f = jnp.float32(n_total)

    orow = lax.broadcasted_iota(jnp.int32, (S, P), 0)
    ocol = lax.broadcasted_iota(jnp.int32, (S, P), 1)
    out_pos = orow * P + ocol                       # flat output-slot ids

    sel0 = flat_f == jnp.float32(0.0)               # one-hot for point 0 (init only)

    px_l, py_l, pz_l = [], [], []
    md0_l, cx0_l, cy0_l, cz0_l = [], [], [], []
    for b in range(bt):
        pxb = pts_ref[3 * b + 0]
        pyb = pts_ref[3 * b + 1]
        pzb = pts_ref[3 * b + 2]
        mag = pxb * pxb + pyb * pyb + pzb * pzb
        # Validity folded into the running min-dist init: invalid points stay pinned
        # at -1 under jnp.minimum (d >= 0), so they can never be selected.
        md0_l.append(jnp.where(mag > 1e-3, jnp.float32(1e10), jnp.float32(-1.0)))
        # First selected point is index 0 -> extract its coordinates once (init only).
        cx0_l.append(_reduce2(jnp.where(sel0, pxb, 0.0), jnp.sum))
        cy0_l.append(_reduce2(jnp.where(sel0, pyb, 0.0), jnp.sum))
        cz0_l.append(_reduce2(jnp.where(sel0, pzb, 0.0), jnp.sum))
        if hoist:
            px_l.append(pxb)
            py_l.append(pyb)
            pz_l.append(pzb)

    def planes(b):
        if hoist:
            return px_l[b], py_l[b], pz_l[b]
        return pts_ref[3 * b + 0], pts_ref[3 * b + 1], pts_ref[3 * b + 2]

    def body(j, carry):
        md, out, cx, cy, cz = carry                 # tuples of length bt
        md_n, out_n, cx_n, cy_n, cz_n = [], [], [], [], []
        for b in range(bt):                          # bt independent chains interleave
            pxb, pyb, pzb = planes(b)
            dx = pxb - cx[b]
            dy = pyb - cy[b]
            dz = pzb - cz[b]
            d = dx * dx + dy * dy + dz * dz          # (8, K)
            m_b = jnp.minimum(md[b], d)

            mx = _reduce2(m_b, jnp.max)              # (1, 1)
            # First (lowest original index) point achieving the maximum.
            nxt_f = _reduce2(jnp.where(m_b == mx, flat_f, big_f), jnp.min)
            sel = flat_f == nxt_f                    # exact one-hot
            cx_n.append(_reduce2(jnp.where(sel, pxb, 0.0), jnp.sum))
            cy_n.append(_reduce2(jnp.where(sel, pyb, 0.0), jnp.sum))
            cz_n.append(_reduce2(jnp.where(sel, pzb, 0.0), jnp.sum))

            out_n.append(jnp.where(out_pos == j, nxt_f.astype(jnp.int32), out[b]))
            md_n.append(m_b)
        return (tuple(md_n), tuple(out_n), tuple(cx_n), tuple(cy_n), tuple(cz_n))

    out0 = tuple(jnp.zeros((S, P), jnp.int32) for _ in range(bt))  # slot 0 -> index 0
    carry0 = (tuple(md0_l), out0, tuple(cx0_l), tuple(cy0_l), tuple(cz0_l))
    _, out_fin, _, _, _ = lax.fori_loop(1, npoint, body, carry0)

    for b in range(bt):
        out_ref[8 * b:8 * (b + 1), :] = out_fin[b]   # one lane-dense store per batch


def furthest_point_sample(points, npoint, *, batch_block=None):
    """points: (B, N, 3) float32 -> (B, npoint) int32 (pointnet2 D-FPS semantics)."""
    B, N, C = points.shape
    assert C == 3, "points must be (B, N, 3)"
    npoint = int(npoint)
    assert npoint >= 1

    pts = jnp.asarray(points, dtype=jnp.float32)

    # Pad the point axis to a multiple of 1024 (8 sublanes x 128 lanes) so every hot
    # (8, K) plane is made of full, unmasked vregs.  Zero points fail the
    # |p|^2 > 1e-3 candidate check so they never affect results.
    n_pad = ((N + 1023) // 1024) * 1024
    assert n_pad < 2 ** 24, "float32-encoded point index requires N_pad < 2^24"
    if n_pad != N:
        pts = jnp.concatenate(
            [pts, jnp.zeros((B, n_pad - N, 3), jnp.float32)], axis=1)
    K = n_pad // 8
    planes_vregs = n_pad // 1024                    # vregs per (8, K) f32 plane

    # (B, N, 3) -> (B, 3, N) -> (B, 3, 8, K): point i sits at (i // K, i % K).
    pts_t = jnp.transpose(pts, (0, 2, 1)).reshape(B, 3, 8, K)

    # Batch blocking: run `bt` independent FPS chains per grid step.  Keep the
    # per-step working set (x/y/z/min-dist per batch + shared index plane) within
    # the vreg budget so the planes stay resident when hoisted.
    if batch_block is None:
        bt = max(1, min(8, B, 40 // (5 * planes_vregs)))
    else:
        bt = max(1, min(int(batch_block), B))
    hoist = bt * 5 * planes_vregs <= 40

    G = pl.cdiv(B, bt)
    b_pad = G * bt
    if b_pad != B:
        pts_t = jnp.concatenate(
            [pts_t, jnp.zeros((b_pad - B, 3, 8, K), jnp.float32)], axis=0)
    # Fold (batch-in-block, coord) into one leading axis: plane 3*b + c.
    pts_g = pts_t.reshape(G, bt * 3, 8, K)

    # Pad npoint to a multiple of 8 for a sublane-dense output tile.
    np_pad = ((npoint + 7) // 8) * 8
    P = np_pad // 8

    kernel = functools.partial(_fps_kernel, npoint=npoint, bt=bt, hoist=hoist)
    out = pl.pallas_call(
        kernel,
        out_shape=jax.ShapeDtypeStruct((G, bt * 8, P), jnp.int32),
        grid=(G,),
        in_specs=[pl.BlockSpec((None, bt * 3, 8, K), lambda g: (g, 0, 0, 0))],
        out_specs=pl.BlockSpec((None, bt * 8, P), lambda g: (g, 0, 0)),
        compiler_params=pltpu.CompilerParams(dimension_semantics=("parallel",)),
    )(pts_g)

    # (G, bt*8, P) -> (b_pad, 8*P): row-major flat slot matches in-kernel out_pos.
    out = out.reshape(b_pad, 8 * P)
    return out[:B, :npoint]


class DFPSSampler:
    """JAX/Pallas equivalent of mmdet3d DFPS_Sampler (no parameters)."""

    def __call__(self, points, features, npoint):
        # features is intentionally unused (D-FPS samples by coordinates only).
        return furthest_point_sample(points, npoint)


def _fps_reference(points, npoint):
    """Pure-JAX reference for correctness checking."""
    def one(pts):
        N = pts.shape[0]
        mag = jnp.sum(pts * pts, axis=1)
        valid = mag > 1e-3
        md0 = jnp.full((N,), 1e10, jnp.float32)
        idxs0 = jnp.zeros((npoint,), jnp.int32)

        def body(j, carry):
            md, idxs, last = carry
            c = pts[last]
            d = jnp.sum((pts - c) ** 2, axis=1)
            md = jnp.minimum(md, d)
            cand = jnp.where(valid, md, -1.0)
            nxt = jnp.argmax(cand).astype(jnp.int32)
            idxs = idxs.at[j].set(nxt)
            return md, idxs, nxt

        _, idxs, _ = lax.fori_loop(1, npoint, body, (md0, idxs0, jnp.int32(0)))
        return idxs

    return jax.vmap(one)(points.astype(jnp.float32))


if __name__ == "__main__":
    key = jax.random.PRNGKey(0)
    B, N, npoint = 2, 128, 16
    points = jax.random.normal(key, (B, N, 3), dtype=jnp.float32)
    features = jax.random.normal(jax.random.PRNGKey(1), (B, 8, N), dtype=jnp.float32)

    sampler = DFPSSampler()
    fps_idx = sampler(points, features, npoint)
    fps_idx = jax.block_until_ready(fps_idx)

    ref_idx = jax.block_until_ready(_fps_reference(points, npoint))
    assert fps_idx.shape == (B, npoint) and fps_idx.dtype == jnp.int32
    assert (fps_idx == ref_idx).all(), (fps_idx, ref_idx)

    print("KERNEL_OK")
</pallas_src>

<mosaic_0001>
module attributes {stable_mosaic.version = 11 : i64} {
  func.func @_fps_kernel(%arg0: i32, %arg1: memref<1x6x8x128xf32, #tpu.memory_space<vmem>>, %arg2: memref<1x16x2xi32, #tpu.memory_space<vmem>>) attributes {dimension_semantics = [#tpu.dimension_semantics<parallel>], iteration_bounds = array<i64: 1>, scalar_prefetch = 0 : i64, scratch_operands = 0 : i64, tpu.core_type = #tpu.core_type<tc>, window_params = [{transform_indices = @transform_0, window_bounds = array<i64: 1, 6, 8, 128>}, {transform_indices = @transform_1, window_bounds = array<i64: 1, 16, 2>}]} {
    %0 = tpu.iota {dimensions = array<i32: 0>} : vector<8x128xi32>
    %1 = tpu.iota {dimensions = array<i32: 1>} : vector<8x128xi32>
    %c128_i32 = arith.constant 128 : i32
    %2 = vector.broadcast %c128_i32 : i32 to vector<8x128xi32>
    %3 = arith.muli %0, %2 : vector<8x128xi32>
    %4 = arith.addi %3, %1 : vector<8x128xi32>
    %5 = arith.sitofp %4 : vector<8x128xi32> to vector<8x128xf32>
    %6 = tpu.iota {dimensions = array<i32: 0>} : vector<8x2xi32>
    %7 = tpu.iota {dimensions = array<i32: 1>} : vector<8x2xi32>
    %c2_i32 = arith.constant 2 : i32
    %8 = vector.broadcast %c2_i32 : i32 to vector<8x2xi32>
    %9 = arith.muli %6, %8 : vector<8x2xi32>
    %10 = arith.addi %9, %7 : vector<8x2xi32>
    %cst = arith.constant 0.000000e+00 : f32
    %11 = vector.broadcast %cst : f32 to vector<8x128xf32>
    %12 = arith.cmpf oeq, %5, %11 : vector<8x128xf32>
    %c0 = arith.constant 0 : index
    %c0_0 = arith.constant 0 : index
    %c0_1 = arith.constant 0 : index
    %c0_2 = arith.constant 0 : index
    %13 = vector.load %arg1[%c0, %c0_0, %c0_1, %c0_2] : memref<1x6x8x128xf32, #tpu.memory_space<vmem>>, vector<1x1x8x128xf32>
    %14 = vector.shape_cast %13 : vector<1x1x8x128xf32> to vector<8x128xf32>
    %c0_3 = arith.constant 0 : index
    %c1 = arith.constant 1 : index
    %c0_4 = arith.constant 0 : index
    %c0_5 = arith.constant 0 : index
    %15 = vector.load %arg1[%c0_3, %c1, %c0_4, %c0_5] : memref<1x6x8x128xf32, #tpu.memory_space<vmem>>, vector<1x1x8x128xf32>
    %16 = vector.shape_cast %15 : vector<1x1x8x128xf32> to vector<8x128xf32>
    %c0_6 = arith.constant 0 : index
    %c2 = arith.constant 2 : index
    %c0_7 = arith.constant 0 : index
    %c0_8 = arith.constant 0 : index
    %17 = vector.load %arg1[%c0_6, %c2, %c0_7, %c0_8] : memref<1x6x8x128xf32, #tpu.memory_space<vmem>>, vector<1x1x8x128xf32>
    %18 = vector.shape_cast %17 : vector<1x1x8x128xf32> to vector<8x128xf32>
    %19 = arith.mulf %14, %14 : vector<8x128xf32>
    %20 = arith.mulf %16, %16 : vector<8x128xf32>
    %21 = arith.addf %19, %20 : vector<8x128xf32>
    %22 = arith.mulf %18, %18 : vector<8x128xf32>
    %23 = arith.addf %21, %22 : vector<8x128xf32>
    %cst_9 = arith.constant 1.000000e-03 : f32
    %24 = vector.broadcast %cst_9 : f32 to vector<8x128xf32>
    %25 = arith.cmpf ogt, %23, %24 : vector<8x128xf32>
    %cst_10 = arith.constant 1.000000e+10 : f32
    %cst_11 = arith.constant -1.000000e+00 : f32
    %26 = vector.broadcast %cst_10 : f32 to vector<8x128xf32>
    %27 = vector.broadcast %cst_11 : f32 to vector<8x128xf32>
    %28 = arith.select %25, %26, %27 : vector<8x128xi1>, vector<8x128xf32>
    %cst_12 = arith.constant 0.000000e+00 : f32
    %29 = vector.broadcast %cst_12 : f32 to vector<8x128xf32>
    %30 = arith.select %12, %14, %29 : vector<8x128xi1>, vector<8x128xf32>
    %cst_13 = arith.constant dense<0.000000e+00> : vector<8xf32>
    %31 = vector.multi_reduction <add>, %30, %cst_13 [1] : vector<8x128xf32> to vector<8xf32>
    %32 = vector.shape_cast %31 : vector<8xf32> to vector<8x1xf32>
    %cst_14 = arith.constant dense<0.000000e+00> : vector<1xf32>
    %33 = vector.multi_reduction <add>, %32, %cst_14 [0] : vector<8x1xf32> to vector<1xf32>
    %34 = vector.shape_cast %33 : vector<1xf32> to vector<1x1xf32>
    %cst_15 = arith.constant 0.000000e+00 : f32
    %35 = vector.broadcast %cst_15 : f32 to vector<8x128xf32>
    %36 = arith.select %12, %16, %35 : vector<8x128xi1>, vector<8x128xf32>
    %cst_16 = arith.constant dense<0.000000e+00> : vector<8xf32>
    %37 = vector.multi_reduction <add>, %36, %cst_16 [1] : vector<8x128xf32> to vector<8xf32>
    %38 = vector.shape_cast %37 : vector<8xf32> to vector<8x1xf32>
    %cst_17 = arith.constant dense<0.000000e+00> : vector<1xf32>
    %39 = vector.multi_reduction <add>, %38, %cst_17 [0] : vector<8x1xf32> to vector<1xf32>
    %40 = vector.shape_cast %39 : vector<1xf32> to vector<1x1xf32>
    %cst_18 = arith.constant 0.000000e+00 : f32
    %41 = vector.broadcast %cst_18 : f32 to vector<8x128xf32>
    %42 = arith.select %12, %18, %41 : vector<8x128xi1>, vector<8x128xf32>
    %cst_19 = arith.constant dense<0.000000e+00> : vector<8xf32>
    %43 = vector.multi_reduction <add>, %42, %cst_19 [1] : vector<8x128xf32> to vector<8xf32>
    %44 = vector.shape_cast %43 : vector<8xf32> to vector<8x1xf32>
    %cst_20 = arith.constant dense<0.000000e+00> : vector<1xf32>
    %45 = vector.multi_reduction <add>, %44, %cst_20 [0] : vector<8x1xf32> to vector<1xf32>
    %46 = vector.shape_cast %45 : vector<1xf32> to vector<1x1xf32>
    %c0_21 = arith.constant 0 : index
    %c3 = arith.constant 3 : index
    %c0_22 = arith.constant 0 : index
    %c0_23 = arith.constant 0 : index
    %47 = vector.load %arg1[%c0_21, %c3, %c0_22, %c0_23] : memref<1x6x8x128xf32, #tpu.memory_space<vmem>>, vector<1x1x8x128xf32>
    %48 = vector.shape_cast %47 : vector<1x1x8x128xf32> to vector<8x128xf32>
    %c0_24 = arith.constant 0 : index
    %c4 = arith.constant 4 : index
    %c0_25 = arith.constant 0 : index
    %c0_26 = arith.constant 0 : index
    %49 = vector.load %arg1[%c0_24, %c4, %c0_25, %c0_26] : memref<1x6x8x128xf32, #tpu.memory_space<vmem>>, vector<1x1x8x128xf32>
    %50 = vector.shape_cast %49 : vector<1x1x8x128xf32> to vector<8x128xf32>
    %c0_27 = arith.constant 0 : index
    %c5 = arith.constant 5 : index
    %c0_28 = arith.constant 0 : index
    %c0_29 = arith.constant 0 : index
    %51 = vector.load %arg1[%c0_27, %c5, %c0_28, %c0_29] : memref<1x6x8x128xf32, #tpu.memory_space<vmem>>, vector<1x1x8x128xf32>
    %52 = vector.shape_cast %51 : vector<1x1x8x128xf32> to vector<8x128xf32>
    %53 = arith.mulf %48, %48 : vector<8x128xf32>
    %54 = arith.mulf %50, %50 : vector<8x128xf32>
    %55 = arith.addf %53, %54 : vector<8x128xf32>
    %56 = arith.mulf %52, %52 : vector<8x128xf32>
    %57 = arith.addf %55, %56 : vector<8x128xf32>
    %cst_30 = arith.constant 1.000000e-03 : f32
    %58 = vector.broadcast %cst_30 : f32 to vector<8x128xf32>
    %59 = arith.cmpf ogt, %57, %58 : vector<8x128xf32>
    %cst_31 = arith.constant 1.000000e+10 : f32
    %cst_32 = arith.constant -1.000000e+00 : f32
    %60 = vector.broadcast %cst_31 : f32 to vector<8x128xf32>
    %61 = vector.broadcast %cst_32 : f32 to vector<8x128xf32>
    %62 = arith.select %59, %60, %61 : vector<8x128xi1>, vector<8x128xf32>
    %cst_33 = arith.constant 0.000000e+00 : f32
    %63 = vector.broadcast %cst_33 : f32 to vector<8x128xf32>
    %64 = arith.select %12, %48, %63 : vector<8x128xi1>, vector<8x128xf32>
    %cst_34 = arith.constant dense<0.000000e+00> : vector<8xf32>
    %65 = vector.multi_reduction <add>, %64, %cst_34 [1] : vector<8x128xf32> to vector<8xf32>
    %66 = vector.shape_cast %65 : vector<8xf32> to vector<8x1xf32>
    %cst_35 = arith.constant dense<0.000000e+00> : vector<1xf32>
    %67 = vector.multi_reduction <add>, %66, %cst_35 [0] : vector<8x1xf32> to vector<1xf32>
    %68 = vector.shape_cast %67 : vector<1xf32> to vector<1x1xf32>
    %cst_36 = arith.constant 0.000000e+00 : f32
    %69 = vector.broadcast %cst_36 : f32 to vector<8x128xf32>
    %70 = arith.select %12, %50, %69 : vector<8x128xi1>, vector<8x128xf32>
    %cst_37 = arith.constant dense<0.000000e+00> : vector<8xf32>
    %71 = vector.multi_reduction <add>, %70, %cst_37 [1] : vector<8x128xf32> to vector<8xf32>
    %72 = vector.shape_cast %71 : vector<8xf32> to vector<8x1xf32>
    %cst_38 = arith.constant dense<0.000000e+00> : vector<1xf32>
    %73 = vector.multi_reduction <add>, %72, %cst_38 [0] : vector<8x1xf32> to vector<1xf32>
    %74 = vector.shape_cast %73 : vector<1xf32> to vector<1x1xf32>
    %cst_39 = arith.constant 0.000000e+00 : f32
    %75 = vector.broadcast %cst_39 : f32 to vector<8x128xf32>
    %76 = arith.select %12, %52, %75 : vector<8x128xi1>, vector<8x128xf32>
    %cst_40 = arith.constant dense<0.000000e+00> : vector<8xf32>
    %77 = vector.multi_reduction <add>, %76, %cst_40 [1] : vector<8x128xf32> to vector<8xf32>
    %78 = vector.shape_cast %77 : vector<8xf32> to vector<8x1xf32>
    %cst_41 = arith.constant dense<0.000000e+00> : vector<1xf32>
    %79 = vector.multi_reduction <add>, %78, %cst_41 [0] : vector<8x1xf32> to vector<1xf32>
    %80 = vector.shape_cast %79 : vector<1xf32> to vector<1x1xf32>
    %c0_i32 = arith.constant 0 : i32
    %81 = vector.broadcast %c0_i32 : i32 to vector<8x2xi32>
    %c0_i32_42 = arith.constant 0 : i32
    %82 = vector.broadcast %c0_i32_42 : i32 to vector<8x2xi32>
    %cst_43 = arith.constant 1.024000e+03 : f32
    %c1_i32 = arith.constant 1 : i32
    %c15_i32 = arith.constant 15 : i32
    %83 = arith.addi %c1_i32, %c15_i32 : i32
    %c1_i32_44 = arith.constant 1 : i32
    %84:10 = scf.for %arg3 = %c1_i32 to %83 step %c1_i32_44 iter_args(%arg4 = %28, %arg5 = %62, %arg6 = %81, %arg7 = %82, %arg8 = %34, %arg9 = %68, %arg10 = %40, %arg11 = %74, %arg12 = %46, %arg13 = %80) -> (vector<8x128xf32>, vector<8x128xf32>, vector<8x2xi32>, vector<8x2xi32>, vector<1x1xf32>, vector<1x1xf32>, vector<1x1xf32>, vector<1x1xf32>, vector<1x1xf32>, vector<1x1xf32>)  : i32 {
      %91 = vector.broadcast %arg8 : vector<1x1xf32> to vector<8x128xf32>
      %92 = arith.subf %14, %91 : vector<8x128xf32>
      %93 = vector.broadcast %arg10 : vector<1x1xf32> to vector<8x128xf32>
      %94 = arith.subf %16, %93 : vector<8x128xf32>
      %95 = vector.broadcast %arg12 : vector<1x1xf32> to vector<8x128xf32>
      %96 = arith.subf %18, %95 : vector<8x128xf32>
      %97 = arith.mulf %92, %92 : vector<8x128xf32>
      %98 = arith.mulf %94, %94 : vector<8x128xf32>
      %99 = arith.addf %97, %98 : vector<8x128xf32>
      %100 = arith.mulf %96, %96 : vector<8x128xf32>
      %101 = arith.addf %99, %100 : vector<8x128xf32>
      %102 = arith.minimumf %arg4, %101 : vector<8x128xf32>
      %cst_51 = arith.constant dense<0xFF800000> : vector<8xf32>
      %103 = vector.multi_reduction <maximumf>, %102, %cst_51 [1] : vector<8x128xf32> to vector<8xf32>
      %104 = vector.shape_cast %103 : vector<8xf32> to vector<8x1xf32>
      %cst_52 = arith.constant dense<0xFF800000> : vector<1xf32>
      %105 = vector.multi_reduction <maximumf>, %104, %cst_52 [0] : vector<8x1xf32> to vector<1xf32>
      %106 = vector.shape_cast %105 : vector<1xf32> to vector<1x1xf32>
      %107 = vector.broadcast %106 : vector<1x1xf32> to vector<8x128xf32>
      %108 = arith.cmpf oeq, %102, %107 : vector<8x128xf32>
      %109 = vector.broadcast %cst_43 : f32 to vector<8x128xf32>
      %110 = arith.select %108, %5, %109 : vector<8x128xi1>, vector<8x128xf32>
      %cst_53 = arith.constant dense<0x7F800000> : vector<8xf32>
      %111 = vector.multi_reduction <minimumf>, %110, %cst_53 [1] : vector<8x128xf32> to vector<8xf32>
      %112 = vector.shape_cast %111 : vector<8xf32> to vector<8x1xf32>
      %cst_54 = arith.constant dense<0x7F800000> : vector<1xf32>
      %113 = vector.multi_reduction <minimumf>, %112, %cst_54 [0] : vector<8x1xf32> to vector<1xf32>
      %114 = vector.shape_cast %113 : vector<1xf32> to vector<1x1xf32>
      %115 = vector.broadcast %114 : vector<1x1xf32> to vector<8x128xf32>
      %116 = arith.cmpf oeq, %5, %115 : vector<8x128xf32>
      %cst_55 = arith.constant 0.000000e+00 : f32
      %117 = vector.broadcast %cst_55 : f32 to vector<8x128xf32>
      %118 = arith.select %116, %14, %117 : vector<8x128xi1>, vector<8x128xf32>
      %cst_56 = arith.constant dense<0.000000e+00> : vector<8xf32>
      %119 = vector.multi_reduction <add>, %118, %cst_56 [1] : vector<8x128xf32> to vector<8xf32>
      %120 = vector.shape_cast %119 : vector<8xf32> to vector<8x1xf32>
      %cst_57 = arith.constant dense<0.000000e+00> : vector<1xf32>
      %121 = vector.multi_reduction <add>, %120, %cst_57 [0] : vector<8x1xf32> to vector<1xf32>
      %122 = vector.shape_cast %121 : vector<1xf32> to vector<1x1xf32>
      %cst_58 = arith.constant 0.000000e+00 : f32
      %123 = vector.broadcast %cst_58 : f32 to vector<8x128xf32>
      %124 = arith.select %116, %16, %123 : vector<8x128xi1>, vector<8x128xf32>
      %cst_59 = arith.constant dense<0.000000e+00> : vector<8xf32>
      %125 = vector.multi_reduction <add>, %124, %cst_59 [1] : vector<8x128xf32> to vector<8xf32>
      %126 = vector.shape_cast %125 : vector<8xf32> to vector<8x1xf32>
      %cst_60 = arith.constant dense<0.000000e+00> : vector<1xf32>
      %127 = vector.multi_reduction <add>, %126, %cst_60 [0] : vector<8x1xf32> to vector<1xf32>
      %128 = vector.shape_cast %127 : vector<1xf32> to vector<1x1xf32>
      %cst_61 = arith.constant 0.000000e+00 : f32
      %129 = vector.broadcast %cst_61 : f32 to vector<8x128xf32>
      %130 = arith.select %116, %18, %129 : vector<8x128xi1>, vector<8x128xf32>
      %cst_62 = arith.constant dense<0.000000e+00> : vector<8xf32>
      %131 = vector.multi_reduction <add>, %130, %cst_62 [1] : vector<8x128xf32> to vector<8xf32>
      %132 = vector.shape_cast %131 : vector<8xf32> to vector<8x1xf32>
      %cst_63 = arith.constant dense<0.000000e+00> : vector<1xf32>
      %133 = vector.multi_reduction <add>, %132, %cst_63 [0] : vector<8x1xf32> to vector<1xf32>
      %134 = vector.shape_cast %133 : vector<1xf32> to vector<1x1xf32>
      %135 = vector.broadcast %arg3 : i32 to vector<8x2xi32>
      %136 = arith.cmpi eq, %10, %135 : vector<8x2xi32>
      %137 = arith.fptosi %114 : vector<1x1xf32> to vector<1x1xi32>
      %138 = vector.shape_cast %137 : vector<1x1xi32> to vector<1x1xi32>
      %139 = vector.broadcast %138 : vector<1x1xi32> to vector<8x2xi32>
      %140 = arith.select %136, %139, %arg6 : vector<8x2xi1>, vector<8x2xi32>
      %141 = vector.broadcast %arg9 : vector<1x1xf32> to vector<8x128xf32>
      %142 = arith.subf %48, %141 : vector<8x128xf32>
      %143 = vector.broadcast %arg11 : vector<1x1xf32> to vector<8x128xf32>
      %144 = arith.subf %50, %143 : vector<8x128xf32>
      %145 = vector.broadcast %arg13 : vector<1x1xf32> to vector<8x128xf32>
      %146 = arith.subf %52, %145 : vector<8x128xf32>
      %147 = arith.mulf %142, %142 : vector<8x128xf32>
      %148 = arith.mulf %144, %144 : vector<8x128xf32>
      %149 = arith.addf %147, %148 : vector<8x128xf32>
      %150 = arith.mulf %146, %146 : vector<8x128xf32>
      %151 = arith.addf %149, %150 : vector<8x128xf32>
      %152 = arith.minimumf %arg5, %151 : vector<8x128xf32>
      %cst_64 = arith.constant dense<0xFF800000> : vector<8xf32>
      %153 = vector.multi_reduction <maximumf>, %152, %cst_64 [1] : vector<8x128xf32> to vector<8xf32>
      %154 = vector.shape_cast %153 : vector<8xf32> to vector<8x1xf32>
      %cst_65 = arith.constant dense<0xFF800000> : vector<1xf32>
      %155 = vector.multi_reduction <maximumf>, %154, %cst_65 [0] : vector<8x1xf32> to vector<1xf32>
      %156 = vector.shape_cast %155 : vector<1xf32> to vector<1x1xf32>
      %157 = vector.broadcast %156 : vector<1x1xf32> to vector<8x128xf32>
      %158 = arith.cmpf oeq, %152, %157 : vector<8x128xf32>
      %159 = vector.broadcast %cst_43 : f32 to vector<8x128xf32>
      %160 = arith.select %158, %5, %159 : vector<8x128xi1>, vector<8x128xf32>
      %cst_66 = arith.constant dense<0x7F800000> : vector<8xf32>
      %161 = vector.multi_reduction <minimumf>, %160, %cst_66 [1] : vector<8x128xf32> to vector<8xf32>
      %162 = vector.shape_cast %161 : vector<8xf32> to vector<8x1xf32>
      %cst_67 = arith.constant dense<0x7F800000> : vector<1xf32>
      %163 = vector.multi_reduction <minimumf>, %162, %cst_67 [0] : vector<8x1xf32> to vector<1xf32>
      %164 = vector.shape_cast %163 : vector<1xf32> to vector<1x1xf32>
      %165 = vector.broadcast %164 : vector<1x1xf32> to vector<8x128xf32>
      %166 = arith.cmpf oeq, %5, %165 : vector<8x128xf32>
      %cst_68 = arith.constant 0.000000e+00 : f32
      %167 = vector.broadcast %cst_68 : f32 to vector<8x128xf32>
      %168 = arith.select %166, %48, %167 : vector<8x128xi1>, vector<8x128xf32>
      %cst_69 = arith.constant dense<0.000000e+00> : vector<8xf32>
      %169 = vector.multi_reduction <add>, %168, %cst_69 [1] : vector<8x128xf32> to vector<8xf32>
      %170 = vector.shape_cast %169 : vector<8xf32> to vector<8x1xf32>
      %cst_70 = arith.constant dense<0.000000e+00> : vector<1xf32>
      %171 = vector.multi_reduction <add>, %170, %cst_70 [0] : vector<8x1xf32> to vector<1xf32>
      %172 = vector.shape_cast %171 : vector<1xf32> to vector<1x1xf32>
      %cst_71 = arith.constant 0.000000e+00 : f32
      %173 = vector.broadcast %cst_71 : f32 to vector<8x128xf32>
      %174 = arith.select %166, %50, %173 : vector<8x128xi1>, vector<8x128xf32>
      %cst_72 = arith.constant dense<0.000000e+00> : vector<8xf32>
      %175 = vector.multi_reduction <add>, %174, %cst_72 [1] : vector<8x128xf32> to vector<8xf32>
      %176 = vector.shape_cast %175 : vector<8xf32> to vector<8x1xf32>
      %cst_73 = arith.constant dense<0.000000e+00> : vector<1xf32>
      %177 = vector.multi_reduction <add>, %176, %cst_73 [0] : vector<8x1xf32> to vector<1xf32>
      %178 = vector.shape_cast %177 : vector<1xf32> to vector<1x1xf32>
      %cst_74 = arith.constant 0.000000e+00 : f32
      %179 = vector.broadcast %cst_74 : f32 to vector<8x128xf32>
      %180 = arith.select %166, %52, %179 : vector<8x128xi1>, vector<8x128xf32>
      %cst_75 = arith.constant dense<0.000000e+00> : vector<8xf32>
      %181 = vector.multi_reduction <add>, %180, %cst_75 [1] : vector<8x128xf32> to vector<8xf32>
      %182 = vector.shape_cast %181 : vector<8xf32> to vector<8x1xf32>
      %cst_76 = arith.constant dense<0.000000e+00> : vector<1xf32>
      %183 = vector.multi_reduction <add>, %182, %cst_76 [0] : vector<8x1xf32> to vector<1xf32>
      %184 = vector.shape_cast %183 : vector<1xf32> to vector<1x1xf32>
      %185 = vector.broadcast %arg3 : i32 to vector<8x2xi32>
      %186 = arith.cmpi eq, %10, %185 : vector<8x2xi32>
      %187 = arith.fptosi %164 : vector<1x1xf32> to vector<1x1xi32>
      %188 = vector.shape_cast %187 : vector<1x1xi32> to vector<1x1xi32>
      %189 = vector.broadcast %188 : vector<1x1xi32> to vector<8x2xi32>
      %190 = arith.select %186, %189, %arg7 : vector<8x2xi1>, vector<8x2xi32>
      scf.yield %102, %152, %140, %190, %122, %172, %128, %178, %134, %184 : vector<8x128xf32>, vector<8x128xf32>, vector<8x2xi32>, vector<8x2xi32>, vector<1x1xf32>, vector<1x1xf32>, vector<1x1xf32>, vector<1x1xf32>, vector<1x1xf32>, vector<1x1xf32>
    }
    %c15_i32_45 = arith.constant 15 : i32
    %c0_46 = arith.constant 0 : index
    %c0_47 = arith.constant 0 : index
    %c0_48 = arith.constant 0 : index
    %85 = vector.load %arg2[%c0_46, %c0_47, %c0_48] : memref<1x16x2xi32, #tpu.memory_space<vmem>>, vector<1x8x2xi32>
    %86 = vector.shape_cast %85 : vector<1x8x2xi32> to vector<8x2xi32>
    %87 = vector.shape_cast %84#2 : vector<8x2xi32> to vector<1x8x2xi32>
    tpu.vector_store %arg2[%c0_46, %c0_47, %c0_48], %87 {strides = array<i32>} : memref<1x16x2xi32, #tpu.memory_space<vmem>>, vector<1x8x2xi32>,
    %c0_49 = arith.constant 0 : index
    %c8 = arith.constant 8 : index
    %c0_50 = arith.constant 0 : index
    %88 = vector.load %arg2[%c0_49, %c8, %c0_50] : memref<1x16x2xi32, #tpu.memory_space<vmem>>, vector<1x8x2xi32>
    %89 = vector.shape_cast %88 : vector<1x8x2xi32> to vector<8x2xi32>
    %90 = vector.shape_cast %84#3 : vector<8x2xi32> to vector<1x8x2xi32>
    tpu.vector_store %arg2[%c0_49, %c8, %c0_50], %90 {strides = array<i32>} : memref<1x16x2xi32, #tpu.memory_space<vmem>>, vector<1x8x2xi32>,
    return
  }
  func.func @transform_0(%arg0: i32) -> (i32, i32, i32, i32) {
    %c0_i32 = arith.constant 0 : i32
    %c0_i32_0 = arith.constant 0 : i32
    %c0_i32_1 = arith.constant 0 : i32
    %c0_i32_2 = arith.constant 0 : i32
    return %arg0, %c0_i32, %c0_i32_0, %c0_i32_1 : i32, i32, i32, i32
  }
  func.func @transform_1(%arg0: i32) -> (i32, i32, i32) {
    %c0_i32 = arith.constant 0 : i32
    %c0_i32_0 = arith.constant 0 : i32
    %c0_i32_1 = arith.constant 0 : i32
    return %arg0, %c0_i32, %c0_i32_0 : i32, i32, i32
  }
}

</mosaic_0001>

<bundles_post_ra>
// kernel: tpu_custom_call.1
= control target key start
LH: loop header
LB: loop body
LE: loop exit
PB: predicated region body
PF: predicated region fallthrough
CT: control target
= control target key end

     0   :  { %6 = vsyncpa [#allocation3], 0  ;;  %s494_s6 = smov [#allocation2]   ;;  %s673_s0 = inlined_call_operand.hbm [shape: f32[1,6,8,128], index: 0, kind: input, shape index: {}]   ;;  %s674_s1 = inlined_call_operand.vmem [shape: s32[1,16,2], index: 1, kind: output, shape index: {}]  }
   0x1   :  { %s12_s7 = sshll.u32 %s494_s6, 4  ;;  %s382_s10 = scalar_lea.hbm %s673_s0, 768  ;;  %s13_s7 = int_to_ptr.vmem [resolvable:$true] %s12_s7 }
   0x2   :  { %p383_p0 = scmp.ne.s32.totalorder %s673_s0, %s382_s10  ;;  %p386_p1 = scmp.lt.u32.totalorder %s382_s10, %s673_s0 }
   0x4   :  { %p388_p2 = pnand %p386_p1, %p383_p0 }
   0x6   :  { %391 = shalt.err (!%p388_p2)
}
   0x7   :  { %s392_s15 = scalar_lea.vmem %s13_s7, 768  ;;  %p397_p4 = scmp.lt.s32.totalorder %s13_s7, %s13_s7 }
   0x8   :  { %p393_p3 = scmp.ne.s32.totalorder %s13_s7, %s392_s15  ;;  %p398_p5 = scmp.lt.s32.totalorder %s392_s15, %s392_s15 }
   0xa   :  { %p399_p6 = por %p398_p5, %p397_p4 }
   0xc   :  { %p400_p7 = pnand %p399_p6, %p393_p3 }
   0xe   :  { %403 = shalt.err (!%p400_p7)
}
   0xf   :  { %s495_s16 = smov 128   ;;  %s496_s17 = smov 8  }
  0x10   :  { %18 = dma.hbm_to_vmem [thread:$0]  %s673_s0, 768, %s13_s7, [#allocation3], %s495_s16, %s495_s16, %s496_s17  }
  0x11   :  { %448 = dma.done.wait [#allocation3], 768  }
  0x12   :  { %449 = vsyncadd [#allocation3], 4294966528  ;;  %v22_v0 = vlaneseq  ;;  %v522_v7 = vld [vmem:[#allocation2] sm:$0xff]  ;;  %v524_v8 = vld [vmem:[#allocation2 + $0x18] sm:$0xff]  ;;  %v497_v28 = vmov -1.0   ;;  %s587_s0 = smov 1  }
  0x13   :  { %v528_v10 = vld [vmem:[#allocation2 + $0x10] sm:$0xff]  ;;  %v37_v11 = vmul.f32 %v522_v7, %v522_v7  ;;  %v77_v12 = vmul.f32 %v524_v8, %v524_v8  ;;  %v534_v13 = vld [vmem:[#allocation2 + $0x8] sm:$0xff]  ;;  %v536_v14 = vld [vmem:[#allocation2 + $0x20] sm:$0xff] }
  0x14   :  { %v23_v1 = vshrl.u32 %v22_v0, 7  ;;  %v25_v2 = vand.u32 127, %v22_v0  ;;  %v38_v15 = vmul.f32 %v534_v13, %v534_v13  ;;  %v540_v16 = vld [vmem:[#allocation2 + $0x28] sm:$0xff]  ;;  %v78_v17 = vmul.f32 %v536_v14, %v536_v14 }
  0x15   :  { %v40_v18 = vmul.f32 %v528_v10, %v528_v10  ;;  %v80_v19 = vmul.f32 %v540_v16, %v540_v16 }
  0x16   :  { %v26_v3 = vmul.u32 128, %v23_v1  ;;  %v29_v4 = vmul.u32 2, %v23_v1  ;;  %v39_v22 = vadd.f32 %v38_v15, %v37_v11  ;;  %v79_v23 = vadd.f32 %v78_v17, %v77_v12 }
  0x18   :  { %v27_v5 = vadd.s32 %v26_v3, %v25_v2  ;;  %v520_v6 = vadd.s32 %v29_v4, %v25_v2  ;;  %v41_v26 = vadd.f32 %v40_v18, %v39_v22  ;;  %v81_v27 = vadd.f32 %v80_v19, %v79_v23 }
  0x19   :  { %v579_v19 = vmov 0  }
  0x1a   :  { %v526_v9 = vcvt.s32.f32 %v27_v5  ;;  %vm42_vm1 = vcmp.gt.f32.partialorder %v41_v26, 0.001  ;;  %vm82_vm2 = vcmp.gt.f32.partialorder %v81_v27, 0.001 }
  0x1b   :  { %v43_v29 = vsel %vm42_vm1, 1e+10, %v497_v28   ;;  %v83_v31 = vsel %vm82_vm2, 1e+10, %v497_v28  }
  0x1c   :  { %vm31_vm0 = vcmp.eq.f32.partialorder %v526_v9, 0.0 }
  0x1d   :  { %v62_v20 = vsel %vm31_vm0, %v528_v10, 0.0  ;;  %v44_v21 = vsel %vm31_vm0, %v522_v7, 0.0  ;;  %v84_v24 = vsel %vm31_vm0, %v524_v8, 0.0  ;;  %v53_v25 = vsel %vm31_vm0, %v534_v13, 0.0 }
  0x1e   :  { %63 = vadd.xlane.f32.xlu1 %v62_v20  ;;  %45 = vadd.xlane.f32.xlu0 %v44_v21  ;;  %v102_v30 = vsel %vm31_vm0, %v540_v16, 0.0  ;;  %v93_v32 = vsel %vm31_vm0, %v536_v14, 0.0  ;;  %v581_v20 = vmov 0  }
  0x22   :  { %85 = vadd.xlane.f32.xlu1 %v84_v24  ;;  %54 = vadd.xlane.f32.xlu0 %v53_v25 }
  0x26   :  { %103 = vadd.xlane.f32.xlu1 %v102_v30  ;;  %94 = vadd.xlane.f32.xlu0 %v93_v32 }
  0xab   :  { %v64_v33 = vpop.xlane.xlu1 %63  ;;  %v46_v34 = vpop.xlane.xlu0 %45 }
  0xac   :  { %v65_v35 = vrot.slane %v64_v33, 4  ;;  %v47_v36 = vrot.slane %v46_v34, 4 }
  0xae   :  { %v66_v37 = vadd.f32 %v65_v35, %v64_v33  ;;  %v48_v38 = vadd.f32 %v47_v36, %v46_v34 }
  0xaf   :  { %v86_v39 = vpop.xlane.xlu1 %85  ;;  %v55_v40 = vpop.xlane.xlu0 %54 }
  0xb0   :  { %v67_v41 = vrot.slane %v66_v37, 2  ;;  %v49_v42 = vrot.slane %v48_v38, 2  ;;  %v87_v43 = vrot.slane %v86_v39, 4  ;;  %v56_v44 = vrot.slane %v55_v40, 4 }
  0xb2   :  { %v68_v45 = vadd.f32 %v67_v41, %v66_v37  ;;  %v50_v46 = vadd.f32 %v49_v42, %v48_v38  ;;  %v88_v47 = vadd.f32 %v87_v43, %v86_v39  ;;  %v57_v48 = vadd.f32 %v56_v44, %v55_v40 }
  0xb3   :  { %v104_v49 = vpop.xlane.xlu1 %103  ;;  %v95_v50 = vpop.xlane.xlu0 %94 }
  0xb4   :  { %v69_v51 = vrot.slane %v68_v45, 1  ;;  %v51_v52 = vrot.slane %v50_v46, 1  ;;  %v89_v53 = vrot.slane %v88_v47, 2  ;;  %v58_v54 = vrot.slane %v57_v48, 2 }
  0xb5   :  { %v105_v55 = vrot.slane %v104_v49, 4  ;;  %v96_v56 = vrot.slane %v95_v50, 4 }
  0xb6   :  { %v70_v57 = vadd.f32 %v69_v51, %v68_v45   ;;  %v52_v58 = vadd.f32 %v51_v52, %v50_v46   ;;  %v90_v59 = vadd.f32 %v89_v53, %v88_v47  ;;  %v59_v60 = vadd.f32 %v58_v54, %v57_v48 }
  0xb7   :  { %v106_v61 = vadd.f32 %v105_v55, %v104_v49  ;;  %v97_v62 = vadd.f32 %v96_v56, %v95_v50 }
  0xb8   :  { %v91_v63 = vrot.slane %v90_v59, 1  ;;  %v60_v0 = vrot.slane %v59_v60, 1 }
  0xb9   :  { %v107_v1 = vrot.slane %v106_v61, 2  ;;  %v98_v2 = vrot.slane %v97_v62, 2 }
  0xba   :  { %v92_v3 = vadd.f32 %v91_v63, %v90_v59   ;;  %v61_v4 = vadd.f32 %v60_v0, %v59_v60  }
  0xbb   :  { %v108_v5 = vadd.f32 %v107_v1, %v106_v61  ;;  %v99_v11 = vadd.f32 %v98_v2, %v97_v62 }
  0xbd   :  { %v109_v12 = vrot.slane %v108_v5, 1  ;;  %v100_v15 = vrot.slane %v99_v11, 1 }
  0xbf   :  { %v110_v17 = vadd.f32 %v109_v12, %v108_v5   ;;  %v101_v18 = vadd.f32 %v100_v15, %v99_v11  }
  0xc0 LB: > { %v127_v21 = vsub.f32 %v522_v7, %v472_v58  ;;  %v128_v22 = vsub.f32 %v534_v13, %v464_v4  ;;  %v129_v23 = vsub.f32 %v528_v10, %v456_v57  ;;  %v188_v27 = vsub.f32 %v540_v16, %v452_v17  ;;  %s492_s0 = sphi %s587_s0, %s116_s0   ;;  %v488_v29 = vphi %v43_v29, %v612_v29   ;;  %v484_v31 = vphi %v83_v31, %v615_v31   ;;  %v480_v20 = vphi %v581_v20, %v678_v20   ;;  %v476_v19 = vphi %v579_v19, %v677_v19   ;;  %v472_v58 = vphi %v52_v58, %v163_v58   ;;  %v468_v3 = vphi %v92_v3, %v222_v3   ;;  %v464_v4 = vphi %v61_v4, %v172_v4   ;;  %v460_v18 = vphi %v101_v18, %v231_v18   ;;  %v456_v57 = vphi %v70_v57, %v181_v57   ;;  %v452_v17 = vphi %v110_v17, %v240_v17  }
  0xc1   : > { %v186_v30 = vsub.f32 %v524_v8, %v468_v3  ;;  %v187_v32 = vsub.f32 %v536_v14, %v460_v18  ;;  %v182_v3 = vstv %s492_s0  ;;  %s116_s0 = sadd.s32 1, %s492_s0  }
  0xc2   : > { %v130_v24 = vmul.f32 %v127_v21, %v127_v21  ;;  %v131_v25 = vmul.f32 %v128_v22, %v128_v22  ;;  %v133_v26 = vmul.f32 %v129_v23, %v129_v23  ;;  %v192_v36 = vmul.f32 %v188_v27, %v188_v27  ;;  %p113_p8 = scmp.ge.s32.totalorder %s116_s0, 16  }
  0xc3   : > { %v189_v34 = vmul.f32 %v186_v30, %v186_v30  ;;  %v190_v35 = vmul.f32 %v187_v32, %v187_v32  ;;  %vm183_vm6 = vcmp.eq.s32.totalorder %v520_v6, %v182_v3  ;;  %vm243_vm8 = vcmask (%p113_p8), 15360  }
  0xc4   : > { %v132_v28 = vadd.f32 %v131_v25, %v130_v24 }
  0xc5   : > { %v191_v37 = vadd.f32 %v190_v35, %v189_v34 }
  0xc6   : > { %v134_v33 = vadd.f32 %v133_v26, %v132_v28 }
  0xc7   : > { %v193_v38 = vadd.f32 %v192_v36, %v191_v37 }
  0xc8   : > { %v612_v29 = vmin.f32 %v488_v29, %v134_v33  }
  0xc9   : > { %v615_v31 = vmin.f32 %v484_v31, %v193_v38  }
  0xca   : > { %136 = vmax.xlane.f32.xlu0 %v612_v29 }
  0xce   : > { %195 = vmax.xlane.f32.xlu0 %v615_v31 }
 0x157   : > { %v137_v39 = vpop.xlane.xlu0 %136 }
 0x158   : > { %v138_v40 = vrot.slane %v137_v39, 4 }
 0x15a   : > { %v139_v41 = vmax.f32 %v137_v39, %v138_v40 }
 0x15b   : > { %v196_v42 = vpop.xlane.xlu0 %195 }
 0x15c   : > { %v140_v43 = vrot.slane %v139_v41, 2  ;;  %v197_v44 = vrot.slane %v196_v42, 4 }
 0x15e   : > { %v141_v45 = vmax.f32 %v139_v41, %v140_v43  ;;  %v198_v46 = vmax.f32 %v196_v42, %v197_v44 }
 0x160   : > { %v199_v47 = vrot.slane %v198_v46, 2  ;;  %v142_v48 = vrot.slane %v141_v45, 1 }
 0x162   : > { %v200_v49 = vmax.f32 %v198_v46, %v199_v47  ;;  %v143_v50 = vmax.f32 %v141_v45, %v142_v48 }
 0x164   : > { %vm144_vm3 = vcmp.eq.f32.partialorder %v612_v29, %v143_v50  ;;  %v201_v51 = vrot.slane %v200_v49, 1 }
 0x165   : > { %v145_v52 = vsel %vm144_vm3, %v526_v9, 1024.0 }
 0x166   : > { %146 = vmin.xlane.f32.xlu1 %v145_v52  ;;  %v202_v53 = vmax.f32 %v200_v49, %v201_v51 }
 0x168   : > { %vm203_vm4 = vcmp.eq.f32.partialorder %v615_v31, %v202_v53 }
 0x169   : > { %v204_v54 = vsel %vm203_vm4, %v526_v9, 1024.0 }
 0x16a   : > { %205 = vmin.xlane.f32.xlu1 %v204_v54 }
 0x1f3   : > { %v147_v55 = vpop.xlane.xlu1 %146 }
 0x1f4   : > { %v148_v56 = vrot.slane %v147_v55, 4 }
 0x1f6   : > { %v149_v57 = vmin.f32 %v147_v55, %v148_v56 }
 0x1f7   : > { %v206_v58 = vpop.xlane.xlu1 %205 }
 0x1f8   : > { %v150_v59 = vrot.slane %v149_v57, 2  ;;  %v207_v60 = vrot.slane %v206_v58, 4 }
 0x1fa   : > { %v151_v61 = vmin.f32 %v149_v57, %v150_v59  ;;  %v208_v62 = vmin.f32 %v206_v58, %v207_v60 }
 0x1fc   : > { %v152_v63 = vrot.slane %v151_v61, 1  ;;  %v209_v0 = vrot.slane %v208_v62, 2 }
 0x1fe   : > { %v210_v1 = vmin.f32 %v208_v62, %v209_v0  ;;  %v153_v2 = vmin.f32 %v151_v61, %v152_v63 }
 0x200   : > { %v211_v4 = vrot.slane %v210_v1, 1  ;;  %vm154_vm5 = vcmp.eq.f32.partialorder %v526_v9, %v153_v2  ;;  %v286_v5 = vtrunc.f32 %v153_v2 }
 0x201   : > { %v155_v11 = vsel %vm154_vm5, %v522_v7, 0.0  ;;  %v164_v12 = vsel %vm154_vm5, %v534_v13, 0.0  ;;  %v173_v22 = vsel %vm154_vm5, %v528_v10, 0.0 }
 0x202   : > { %v287_v15 = vcvt.f32.s32 %v286_v5  ;;  %156 = vadd.xlane.f32.xlu0 %v155_v11  ;;  %165 = vadd.xlane.f32.xlu1 %v164_v12  ;;  %v212_v17 = vmin.f32 %v210_v1, %v211_v4 }
 0x204   : > { %v628_v20 = vsel %vm183_vm6, %v287_v15, %v480_v20   ;;  %vm213_vm7 = vcmp.eq.f32.partialorder %v526_v9, %v212_v17  ;;  %v288_v18 = vtrunc.f32 %v212_v17 }
 0x205   : > { %v675_v21 = vmov %v628_v20  ;;  %v214_v23 = vsel %vm213_vm7, %v524_v8, 0.0  ;;  %v223_v26 = vsel %vm213_vm7, %v536_v14, 0.0  ;;  %v232_v27 = vsel %vm213_vm7, %v540_v16, 0.0 }
 0x206   : > { %174 = vadd.xlane.f32.xlu0 %v173_v22  ;;  %v289_v24 = vcvt.f32.s32 %v288_v18  ;;  %215 = vadd.xlane.f32.xlu1 %v214_v23  ;;  %244 = vst.msk [vmem:[%s674_s1] sm:$0xff] (%p113_p8), %vm243_vm8, %v675_v21 }
 0x208   : > { %v634_v19 = vsel %vm183_vm6, %v289_v24, %v476_v19  }
 0x209   : > { %v676_v25 = vmov %v634_v19 }
 0x20a   : > { %224 = vadd.xlane.f32.xlu0 %v223_v26  ;;  %233 = vadd.xlane.f32.xlu1 %v232_v27  ;;  %245 = vst.msk [vmem:[%s674_s1 + $0x8] sm:$0xff] (%p113_p8), %vm243_vm8, %v676_v25 }
 0x28f   : > { %v166_v20 = vpop.xlane.xlu1 %165  ;;  %v157_v28 = vpop.xlane.xlu0 %156 }
 0x290   : > { %v167_v30 = vrot.slane %v166_v20, 4  ;;  %v158_v32 = vrot.slane %v157_v28, 4 }
 0x292   : > { %v168_v33 = vadd.f32 %v167_v30, %v166_v20  ;;  %v159_v34 = vadd.f32 %v158_v32, %v157_v28  ;;  %v678_v20 = vmov %v675_v21 }
 0x293   : > { %v216_v35 = vpop.xlane.xlu1 %215  ;;  %v175_v36 = vpop.xlane.xlu0 %174 }
 0x294   : > { %v169_v37 = vrot.slane %v168_v33, 2  ;;  %v160_v38 = vrot.slane %v159_v34, 2  ;;  %v217_v39 = vrot.slane %v216_v35, 4  ;;  %v176_v40 = vrot.slane %v175_v36, 4 }
 0x296   : > { %v170_v41 = vadd.f32 %v169_v37, %v168_v33  ;;  %v161_v19 = vadd.f32 %v160_v38, %v159_v34  ;;  %v218_v42 = vadd.f32 %v217_v39, %v216_v35  ;;  %v177_v43 = vadd.f32 %v176_v40, %v175_v36 }
 0x297   : > { %v234_v44 = vpop.xlane.xlu1 %233  ;;  %v225_v45 = vpop.xlane.xlu0 %224 }
 0x298   : > { %v171_v46 = vrot.slane %v170_v41, 1  ;;  %v162_v47 = vrot.slane %v161_v19, 1  ;;  %v219_v48 = vrot.slane %v218_v42, 2  ;;  %v178_v49 = vrot.slane %v177_v43, 2 }
 0x299   : > { %v235_v50 = vrot.slane %v234_v44, 4  ;;  %v226_v51 = vrot.slane %v225_v45, 4 }
 0x29a   : > { %v172_v4 = vadd.f32 %v171_v46, %v170_v41   ;;  %v163_v58 = vadd.f32 %v162_v47, %v161_v19   ;;  %v220_v52 = vadd.f32 %v219_v48, %v218_v42  ;;  %v179_v53 = vadd.f32 %v178_v49, %v177_v43 }
 0x29b   : > { %v236_v54 = vadd.f32 %v235_v50, %v234_v44  ;;  %v227_v55 = vadd.f32 %v226_v51, %v225_v45  ;;  %v677_v19 = vmov %v676_v25 }
 0x29c   : > { %v221_v56 = vrot.slane %v220_v52, 1  ;;  %v180_v57 = vrot.slane %v179_v53, 1 }
 0x29d   : > { %v237_v59 = vrot.slane %v236_v54, 2  ;;  %v228_v60 = vrot.slane %v227_v55, 2  ;;  %115 = sbr.rel (!%p113_p8) target bundleno = 192 (0xc0), region = 40 }
 0x29e   : > { %v222_v3 = vadd.f32 %v221_v56, %v220_v52   ;;  %v181_v57 = vadd.f32 %v180_v57, %v179_v53  }
 0x29f   : > { %v238_v61 = vadd.f32 %v237_v59, %v236_v54  ;;  %v229_v62 = vadd.f32 %v228_v60, %v227_v55 }
 0x2a1   : > { %v239_v63 = vrot.slane %v238_v61, 1  ;;  %v230_v0 = vrot.slane %v229_v62, 1 }
 0x2a3   : > { %v240_v17 = vadd.f32 %v239_v63, %v238_v61   ;;  %v231_v18 = vadd.f32 %v230_v0, %v229_v62  }
 0x2a4   :  { %250 = vsyncpa [#allocation3], 1 }

</bundles_post_ra>
